<compile_context>
chip_gen: v5e
topology: v5e:2x2
jax: 0.10.0
libtpu: 0.0.40
codegen_flags: <defaults>
</compile_context>

<pallas_src>
import numpy as np
import jax
import jax.numpy as jnp
from jax.experimental import pallas as pl
from jax.experimental.pallas import tpu as pltpu


def _disc_kernel(c_ref, h_ref, w_ref, b_ref, out_ref):
    # c_ref: (2B, H)  rows [c1_b0..c1_bB-1, c2_b0..c2_bB-1]
    # h_ref: (B, 4N, H)  node blocks ordered [h2, h1, h4, h3]
    # w_ref: (H, H) bilinear weight; b_ref: (1, 1) bias in SMEM
    # out_ref: (B, 4N) logits in the PyTorch order [sc1 | sc2 | sc3 | sc4]
    B, M = out_ref.shape          # M = 4 * N
    N = M // 4

    # z[r, :] = W @ c_r  -- contract over W's second axis directly (no W.T temp).
    z = jax.lax.dot_general(
        c_ref[...], w_ref[...],
        dimension_numbers=(((1,), (1,)), ((), ())),
        preferred_element_type=jnp.float32)                       # (2B, H)

    # (B, 2, H): context j=0 -> z1 (from c1), j=1 -> z2 (from c2).
    z_both = jnp.concatenate([z[:B][:, None, :], z[B:][:, None, :]], axis=1)

    # One batched MXU contraction: every node block scored against both contexts.
    s = jnp.einsum('bjh,bmh->bjm', z_both, h_ref[...],
                   preferred_element_type=jnp.float32)             # (B, 2, 4N)

    # Node blocks [h2, h1, h4, h3]: blocks 0,2 pair with z1, blocks 1,3 with z2.
    col = jax.lax.broadcasted_iota(jnp.int32, (B, M), 1)
    use_z1 = (col % (2 * N)) < N
    out_ref[...] = jnp.where(use_z1, s[:, 0, :], s[:, 1, :]) + b_ref[0, 0]


@jax.jit
def discriminator_forward(c1, c2, h1, h2, h3, h4, weight, bias):
    """c1,c2: (B,H); h1..h4: (B,N,H); weight: (H,H); bias: (1,1) -> (B,4N)."""
    B, N, H = h1.shape
    c_pair = jnp.concatenate([c1, c2], axis=0)                     # (2B, H)
    h_all = jnp.concatenate([h2, h1, h4, h3], axis=1)              # (B, 4N, H)
    bias2d = jnp.reshape(bias, (1, 1)).astype(jnp.float32)

    vmem = pl.BlockSpec(memory_space=pltpu.MemorySpace.VMEM)
    smem = pl.BlockSpec(memory_space=pltpu.MemorySpace.SMEM)
    return pl.pallas_call(
        _disc_kernel,
        out_shape=jax.ShapeDtypeStruct((B, 4 * N), jnp.float32),
        in_specs=[vmem, vmem, vmem, smem],
        out_specs=vmem,
    )(c_pair, h_all, weight, bias2d)


def _reference_forward(c1, c2, h1, h2, h3, h4, weight, bias):
    # Pure-JAX reference of the PyTorch module.
    def bilinear(h, c):
        # (B,N,H) x (H,H) x (B,H) -> (B,N)
        return jnp.einsum("bnh,hk,bk->bn", h, weight, c) + bias[0, 0]
    sc1 = bilinear(h2, c1)
    sc2 = bilinear(h1, c2)
    sc3 = bilinear(h4, c1)
    sc4 = bilinear(h3, c2)
    return jnp.concatenate([sc1, sc2, sc3, sc4], axis=1)


if __name__ == "__main__":
    # Small shapes: batch=2, nodes=8, hidden=32
    B, N, H = 2, 8, 32

    key = jax.random.PRNGKey(0)
    k_c1, k_c2, k_h1, k_h2, k_h3, k_h4, k_w = jax.random.split(key, 7)

    c1 = jax.random.normal(k_c1, (B, H), dtype=jnp.float32)
    c2 = jax.random.normal(k_c2, (B, H), dtype=jnp.float32)
    h1 = jax.random.normal(k_h1, (B, N, H), dtype=jnp.float32)
    h2 = jax.random.normal(k_h2, (B, N, H), dtype=jnp.float32)
    h3 = jax.random.normal(k_h3, (B, N, H), dtype=jnp.float32)
    h4 = jax.random.normal(k_h4, (B, N, H), dtype=jnp.float32)

    # Deterministic xavier_uniform init for Bilinear weight (1, H, H) -> (H, H).
    # PyTorch fan_in = H*H, fan_out = 1*H for this tensor shape.
    fan_in, fan_out = H * H, H
    bound = float(np.sqrt(6.0 / (fan_in + fan_out)))
    weight = jax.random.uniform(k_w, (H, H), dtype=jnp.float32,
                                minval=-bound, maxval=bound)
    bias = jnp.zeros((1, 1), dtype=jnp.float32)  # bias.data.fill_(0.0)

    logits = discriminator_forward(c1, c2, h1, h2, h3, h4, weight, bias)
    logits = jax.block_until_ready(logits)

    ref = _reference_forward(c1, c2, h1, h2, h3, h4, weight, bias)
    np.testing.assert_allclose(np.asarray(logits), np.asarray(ref),
                               rtol=1e-5, atol=1e-5)
    assert logits.shape == (B, 4 * N)

    print("KERNEL_OK")
</pallas_src>

<mosaic_0001>
module attributes {stable_mosaic.version = 11 : i64} {
  func.func @_disc_kernel(%arg0: memref<4x32xf32, #tpu.memory_space<vmem>>, %arg1: memref<2x32x32xf32, #tpu.memory_space<vmem>>, %arg2: memref<32x32xf32, #tpu.memory_space<vmem>>, %arg3: memref<1x1xf32, #tpu.memory_space<smem>>, %arg4: memref<2x32xf32, #tpu.memory_space<vmem>>) attributes {dimension_semantics = [], scalar_prefetch = 0 : i64, scratch_operands = 0 : i64, tpu.core_type = #tpu.core_type<tc>} {
    %c0 = arith.constant 0 : index
    %c0_0 = arith.constant 0 : index
    %0 = vector.load %arg0[%c0, %c0_0] : memref<4x32xf32, #tpu.memory_space<vmem>>, vector<4x32xf32>
    %c0_1 = arith.constant 0 : index
    %c0_2 = arith.constant 0 : index
    %1 = vector.load %arg2[%c0_1, %c0_2] : memref<32x32xf32, #tpu.memory_space<vmem>>, vector<32x32xf32>
    %cst = arith.constant dense<0.000000e+00> : vector<4x32xf32>
    %2 = tpu.matmul %0, %1, %cst {dimension_numbers = #tpu.dot_dimension_numbers<[1], [1], [0], [0], [0, 0, 1, 0], [], []>} : vector<4x32xf32>, vector<32x32xf32>, vector<4x32xf32> -> vector<4x32xf32>
    %3 = vector.extract_strided_slice %2 {offsets = [0, 0], sizes = [2, 32], strides = [1, 1]} : vector<4x32xf32> to vector<2x32xf32>
    %4 = vector.shape_cast %3 : vector<2x32xf32> to vector<2x1x32xf32>
    %5 = vector.extract_strided_slice %2 {offsets = [2, 0], sizes = [2, 32], strides = [1, 1]} : vector<4x32xf32> to vector<2x32xf32>
    %6 = vector.shape_cast %5 : vector<2x32xf32> to vector<2x1x32xf32>
    %7 = tpu.concatenate %4, %6 in 1 : vector<2x1x32xf32>, vector<2x1x32xf32> -> vector<2x2x32xf32>
    %c0_3 = arith.constant 0 : index
    %c0_4 = arith.constant 0 : index
    %c0_5 = arith.constant 0 : index
    %8 = vector.load %arg1[%c0_3, %c0_4, %c0_5] : memref<2x32x32xf32, #tpu.memory_space<vmem>>, vector<2x32x32xf32>
    "tpu.trace_start"() <{level = 10 : i32, message = "bjh,bmh->bjm"}> : () -> ()
    %cst_6 = arith.constant dense<0.000000e+00> : vector<2x2x32xf32>
    %9 = tpu.matmul %7, %8, %cst_6 {dimension_numbers = #tpu.dot_dimension_numbers<[2], [2], [1], [1], [0, 0, 0, 1, 1, 1], [0], [0]>} : vector<2x2x32xf32>, vector<2x32x32xf32>, vector<2x2x32xf32> -> vector<2x2x32xf32>
    "tpu.trace_stop"() : () -> ()
    %10 = tpu.iota {dimensions = array<i32: 1>} : vector<2x32xi32>
    %c16_i32 = arith.constant 16 : i32
    %c0_i32 = arith.constant 0 : i32
    %11 = arith.cmpi eq, %c16_i32, %c0_i32 : i32
    %c1_i32 = arith.constant 1 : i32
    %12 = arith.select %11, %c1_i32, %c16_i32 : i32
    %13 = vector.broadcast %12 : i32 to vector<2x32xi32>
    %14 = arith.remsi %10, %13 : vector<2x32xi32>
    %c0_i32_7 = arith.constant 0 : i32
    %15 = vector.broadcast %c0_i32_7 : i32 to vector<2x32xi32>
    %16 = arith.cmpi ne, %14, %15 : vector<2x32xi32>
    %c0_i32_8 = arith.constant 0 : i32
    %17 = vector.broadcast %c0_i32_8 : i32 to vector<2x32xi32>
    %18 = arith.cmpi slt, %14, %17 : vector<2x32xi32>
    %c0_i32_9 = arith.constant 0 : i32
    %19 = arith.cmpi slt, %12, %c0_i32_9 : i32
    %20 = vector.broadcast %19 : i1 to vector<2x32xi1>
    %21 = vector.broadcast %20 : vector<2x32xi1> to vector<2x32xi1>
    %22 = arith.xori %18, %21 : vector<2x32xi1>
    %23 = arith.andi %22, %16 : vector<2x32xi1>
    %24 = vector.broadcast %12 : i32 to vector<2x32xi32>
    %25 = arith.addi %14, %24 : vector<2x32xi32>
    %26 = arith.select %23, %25, %14 : vector<2x32xi1>, vector<2x32xi32>
    %c8_i32 = arith.constant 8 : i32
    %27 = vector.broadcast %c8_i32 : i32 to vector<2x32xi32>
    %28 = arith.cmpi slt, %26, %27 : vector<2x32xi32>
    %29 = vector.extract_strided_slice %9 {offsets = [0, 0, 0], sizes = [2, 1, 32], strides = [1, 1, 1]} : vector<2x2x32xf32> to vector<2x1x32xf32>
    %30 = vector.shape_cast %29 : vector<2x1x32xf32> to vector<2x32xf32>
    %31 = vector.extract_strided_slice %9 {offsets = [0, 1, 0], sizes = [2, 1, 32], strides = [1, 1, 1]} : vector<2x2x32xf32> to vector<2x1x32xf32>
    %32 = vector.shape_cast %31 : vector<2x1x32xf32> to vector<2x32xf32>
    %33 = arith.select %28, %30, %32 : vector<2x32xi1>, vector<2x32xf32>
    %c0_10 = arith.constant 0 : index
    %c0_11 = arith.constant 0 : index
    %34 = memref.load %arg3[%c0_10, %c0_11] : memref<1x1xf32, #tpu.memory_space<smem>>
    %35 = vector.broadcast %34 : f32 to vector<2x32xf32>
    %36 = arith.addf %33, %35 : vector<2x32xf32>
    %c0_12 = arith.constant 0 : index
    %c0_13 = arith.constant 0 : index
    %37 = vector.load %arg4[%c0_12, %c0_13] : memref<2x32xf32, #tpu.memory_space<vmem>>, vector<2x32xf32>
    tpu.vector_store %arg4[%c0_12, %c0_13], %36 {strides = array<i32>} : memref<2x32xf32, #tpu.memory_space<vmem>>, vector<2x32xf32>,
    return
  }
}

</mosaic_0001>

<bundles_post_ra>
// kernel: discriminator_forward.1
= control target key start
LH: loop header
LB: loop body
LE: loop exit
PB: predicated region body
PF: predicated region fallthrough
CT: control target
= control target key end

     0   :  { %vm24_vm0 = vcmask 261120   ;;  %s327_s0 = inlined_call_operand.vmem [shape: f32[4,32], index: 0, kind: input, shape index: {}]   ;;  %s328_s1 = inlined_call_operand.vmem [shape: f32[2,32,32], index: 1, kind: input, shape index: {}]   ;;  %s329_s2 = inlined_call_operand.vmem [shape: f32[32,32], index: 2, kind: input, shape index: {}]   ;;  %s330_s3 = inlined_call_operand.<no memory space> [shape: f32[1,1], index: 3, kind: input, shape index: {}]   ;;  %s331_s4 = inlined_call_operand.hbm [shape: f32[2,32], index: 4, kind: output, shape index: {}]  }
   0x1   :  { %v23_v0 = vld [vmem:[%s329_s2 + $0x18] sm:$0xff]  ;;  %v22_v2 = vld [vmem:[%s329_s2 + $0x10] sm:$0xff] }
   0x2   :  { %199 = vmatpush.xpose.msk.msra.mxu0 %vm24_vm0, %v23_v0  ;;  %v78_v1 = vld [vmem:[%s328_s1 + $0x18] sm:$0xff] }
   0x3   :  { %204 = vmatpush.xpose.msk.msra.mxu1 %vm24_vm0, %v78_v1  ;;  %v82_v3 = vld [vmem:[%s328_s1 + $0x38] sm:$0xff] }
   0x4   :  { %10 = vsyncpa [#allocation4], 0  ;;  %209 = vmatpush.xpose.msk.msra.mxu2 %vm24_vm0, %v82_v3  ;;  %v21_v4 = vld [vmem:[%s329_s2 + $0x8] sm:$0xff]  ;;  %v20_v5 = vld [vmem:[%s329_s2] sm:$0xff]  ;;  %vm72_vm1 = vcmask 1040384   ;;  %v153_v21 = vlaneseq  ;;  %vm171_vm2 = vcmask 1041409   ;;  %v179_v28 = vstv %s330_s3 }
   0x5   :  { %v19_v6 = vld [vmem:[%s327_s0] sm:$0xf]  ;;  %v77_v7 = vld [vmem:[%s328_s1 + $0x10] sm:$0xff]  ;;  %v76_v9 = vld [vmem:[%s328_s1 + $0x8] sm:$0xff]  ;;  %s241_s14 = smov [#allocation3]   ;;  %s190_s18 = sshll.u32 %s331_s4, 4  ;;  %s191_s18 = int_to_ptr.hbm [resolvable:$true] %s190_s18 }
   0x6   :  { %200 = vmatpush.xpose.msk.msra.mxu0 %vm24_vm0, %v22_v2  ;;  %v81_v8 = vld [vmem:[%s328_s1 + $0x30] sm:$0xff]  ;;  %v80_v10 = vld [vmem:[%s328_s1 + $0x28] sm:$0xff]  ;;  %v75_v11 = vld [vmem:[%s328_s1] sm:$0xff]  ;;  %v154_v22 = vand.u32 127, %v153_v21  ;;  %s188_s15 = sshll.u32 %s241_s14, 4  ;;  %vm181_vm4 = vcmask 254976   ;;  %s189_s15 = int_to_ptr.vmem [resolvable:$true] %s188_s15 }
   0x7   :  { %205 = vmatpush.xpose.msk.msra.mxu1 %vm24_vm0, %v77_v7  ;;  %v79_v12 = vld [vmem:[%s328_s1 + $0x20] sm:$0xff] }
   0x8   :  { %210 = vmatpush.xpose.msk.msra.mxu2 %vm24_vm0, %v81_v8  ;;  %v159_v23 = vand.u32 15, %v154_v22 }
   0xa   :  { %201 = vmatpush.xpose.msk.msra.mxu0 %vm24_vm0, %v21_v4  ;;  %vm167_vm3 = vcmp.lt.s32.totalorder %v159_v23, 8 }
   0xb   :  { %206 = vmatpush.xpose.msk.msra.mxu1 %vm24_vm0, %v76_v9 }
   0xc   :  { %211 = vmatpush.xpose.msk.msra.mxu2 %vm24_vm0, %v80_v10 }
   0xe   :  { %202 = vmatpush.xpose.msk.msra.mxu0 %vm24_vm0, %v20_v5 }
   0xf   :  { %207 = vmatpush.xpose.msk.msra.mxu1 %vm24_vm0, %v75_v11 }
  0x10   :  { %212 = vmatpush.xpose.msk.msra.mxu2 %vm24_vm0, %v79_v12 }
  0x11   :  { %203 = vmatmul.msk.f32.vlgmr.msra.gmra.mxu0 %vm24_vm0, %v19_v6 }
  0x8e   :  { %v57_v13 = vpop.f32.mrf.mxu0 }
  0x8f   :  { %63 = vst [vmem:[#allocation1] sm:$0xff] %v57_v13  ;;  %v61_v16 = vrot.slane %v57_v13, 1 }
  0x96   :  { %v65_v14 = vld [vmem:[#allocation1 + $0x2] ss:$9 sm:$0xff] }
  0x97   :  { %v67_v15 = vld [vmem:[#allocation1 + $0x3] ss:$9 sm:$0xff]  ;;  %v68_v17 = vperm.slane %v65_v14, 0 }
  0x98   :  { %v69_v18 = vperm.slane %v67_v15, 0 }
  0x99   :  { %v73_v19 = vsel %vm72_vm1, %v57_v13, %v68_v17 }
  0x9a   :  { %v74_v20 = vsel %vm72_vm1, %v61_v16, %v69_v18  ;;  %208 = vmatmul.msk.f32.vlgmr.msra.gmra.mxu1 %vm24_vm0, %v73_v19 }
  0x9b   :  { %213 = vmatmul.msk.f32.vlgmr.msra.gmra.mxu2 %vm24_vm0, %v74_v20 }
 0x117   :  { %v115_v24 = vpop.f32.mrf.mxu1 }
 0x118   :  { %v174_v26 = vrot.slane %v115_v24, 1 }
 0x11e   :  { %v150_v25 = vpop.f32.mrf.mxu2 }
 0x11f   :  { %v170_v27 = vrot.slane %v150_v25, 7  ;;  %v175_v30 = vsel %vm171_vm2, %v150_v25, %v174_v26 }
 0x121   :  { %v172_v29 = vsel %vm171_vm2, %v170_v27, %v115_v24 }
 0x122   :  { %v177_v31 = vsel %vm167_vm3, %v172_v29, %v175_v30 }
 0x123   :  { %v180_v32 = vadd.f32 %v179_v28, %v177_v31 }
 0x125   :  { %182 = vst.msk [vmem:[#allocation3] sm:$0x3] %vm181_vm4, %v180_v32 }
 0x126   :  { %193 = dma.vmem_to_hbm [thread:$0]  %s189_s15, 32, %s191_s18, [#allocation4]  }
 0x127   :  { %239 = dma.done.wait [#allocation4], 32  }
 0x128   :  { %240 = vsyncadd [#allocation4], 4294967264 }
 0x129   :  { %198 = vsyncpa [#allocation4], 1 }

</bundles_post_ra>
